<compile_context>
chip_gen: v7x
topology: tpu7x:2x2x1
jax: 0.10.0
libtpu: 0.0.40
codegen_flags: <defaults>
</compile_context>

<pallas_src>
import functools

import jax
import jax.numpy as jnp
import numpy as np
from jax.experimental import pallas as pl
from jax.experimental.pallas import tpu as pltpu

# ---------------- config (scaled-down synthetic BERT encoder) ----------------
HIDDEN = 768            # fixed by torch.nn.Linear(768, 1) head
NUM_HEADS = 12
HEAD_DIM = HIDDEN // NUM_HEADS
INTERMEDIATE = 3072
NUM_LAYERS = 2          # TODO(synk): bert-base-uncased has 12 layers + pretrained weights
VOCAB = 1000
MAX_POS = 64
TYPE_VOCAB = 2
LN_EPS = 1e-12
VMEM_LIMIT = 48 * 1024 * 1024   # <= v7x 64 MiB physical; raises v5e/v6e scoped default


# ---------------------------- Pallas kernels ---------------------------------

def _linear_kernel(*refs, activation, fuse_add_ln, multi_k, eps):
    """One (tm, N) output tile.

    refs layout: x, w, bias, [res, ln_g, ln_b], out, [f32 acc scratch].
    Single-K-step: compute + epilogue directly (no zero-init, no scratch).
    Multi-K-step: accumulate in f32 scratch, epilogue (bias [+gelu] [+add+LN])
    only at the last k step, single bf16 store.
    """
    if fuse_add_ln:
        x_ref, w_ref, b_ref, res_ref, g_ref, bln_ref = refs[:6]
        rest = refs[6:]
    else:
        x_ref, w_ref, b_ref = refs[:3]
        rest = refs[3:]
    o_ref = rest[0]
    acc_ref = rest[1] if multi_k else None

    # bf16 MXU operands, f32 accumulation.
    part = jnp.dot(x_ref[...], w_ref[...], preferred_element_type=jnp.float32)

    def epilogue(acc):
        y = acc + b_ref[...]
        if activation == "gelu":
            # TODO(synk): HF BERT uses exact erf-GELU; tanh approximation used here.
            y = jax.nn.gelu(y, approximate=True)
        if fuse_add_ln:
            y = y + res_ref[...].astype(jnp.float32)
            mu = jnp.mean(y, axis=-1, keepdims=True)
            var = jnp.mean(jnp.square(y - mu), axis=-1, keepdims=True)
            y = (y - mu) * jax.lax.rsqrt(var + eps)
            y = y * g_ref[...] + bln_ref[...]
        o_ref[...] = y.astype(o_ref.dtype)

    if multi_k:
        k = pl.program_id(1)

        @pl.when(k == 0)
        def _():
            acc_ref[...] = part

        @pl.when(k > 0)
        def _():
            acc_ref[...] += part

        @pl.when(k == pl.num_programs(1) - 1)
        def _():
            epilogue(acc_ref[...])
    else:
        epilogue(part)


def pallas_linear(x, w, b, *, activation="none", residual=None, ln_g=None, ln_b=None,
                  tm=512, tk=768, out_dtype=jnp.bfloat16, eps=LN_EPS):
    """y = x @ w + b, optional fused GELU or fused (y + residual) -> LayerNorm.

    x:[M,K] bf16, w:[K,N] bf16, b:[N] f32 -> [M,N] bf16.
    tn is always N so the weight block stays VMEM-resident across the M loop
    and the fused LN epilogue sees the full feature row.
    """
    M, K = x.shape
    Kw, N = w.shape
    assert K == Kw
    tm = min(tm, M)
    tk = min(tk, K)
    assert M % tm == 0 and K % tk == 0
    fuse_add_ln = residual is not None
    multi_k = (K // tk) > 1

    kernel = functools.partial(_linear_kernel, activation=activation,
                               fuse_add_ln=fuse_add_ln, multi_k=multi_k, eps=eps)

    if multi_k:
        grid = (M // tm, K // tk)
        x_spec = pl.BlockSpec((tm, tk), lambda i, k: (i, k))
        w_spec = pl.BlockSpec((tk, N), lambda i, k: (k, 0))
        vec_spec = pl.BlockSpec((1, N), lambda i, k: (0, 0))
        row_spec = pl.BlockSpec((tm, N), lambda i, k: (i, 0))
        scratch = [pltpu.VMEM((tm, N), jnp.float32)]
        dims = ("parallel", "arbitrary")
    else:
        grid = (M // tm,)
        x_spec = pl.BlockSpec((tm, tk), lambda i: (i, 0))
        w_spec = pl.BlockSpec((tk, N), lambda i: (0, 0))
        vec_spec = pl.BlockSpec((1, N), lambda i: (0, 0))
        row_spec = pl.BlockSpec((tm, N), lambda i: (i, 0))
        scratch = []
        dims = ("parallel",)

    in_specs = [x_spec, w_spec, vec_spec]
    args = [x.astype(jnp.bfloat16), w.astype(jnp.bfloat16),
            b.reshape(1, N).astype(jnp.float32)]
    if fuse_add_ln:
        in_specs += [row_spec, vec_spec, vec_spec]
        args += [residual.astype(jnp.bfloat16),
                 ln_g.reshape(1, N).astype(jnp.float32),
                 ln_b.reshape(1, N).astype(jnp.float32)]

    return pl.pallas_call(
        kernel,
        out_shape=jax.ShapeDtypeStruct((M, N), out_dtype),
        grid_spec=pltpu.PrefetchScalarGridSpec(
            num_scalar_prefetch=0,
            grid=grid,
            in_specs=in_specs,
            out_specs=row_spec,
            scratch_shapes=scratch),
        compiler_params=pltpu.CompilerParams(
            dimension_semantics=dims,
            vmem_limit_bytes=VMEM_LIMIT),
    )(*args)


def _ln_kernel(x_ref, g_ref, b_ref, o_ref, *, eps):
    x = x_ref[...].astype(jnp.float32)
    mu = jnp.mean(x, axis=-1, keepdims=True)
    var = jnp.mean(jnp.square(x - mu), axis=-1, keepdims=True)
    y = (x - mu) * jax.lax.rsqrt(var + eps)
    o_ref[...] = (y * g_ref[...] + b_ref[...]).astype(o_ref.dtype)


def pallas_layernorm(x, gamma, beta, eps=LN_EPS, tm=512, out_dtype=jnp.bfloat16):
    """LayerNorm over the last dim (embedding LN; no residual), M-tiled, bf16 out."""
    M, H = x.shape
    tm = min(tm, M)
    assert M % tm == 0
    return pl.pallas_call(
        functools.partial(_ln_kernel, eps=eps),
        out_shape=jax.ShapeDtypeStruct((M, H), out_dtype),
        grid=(M // tm,),
        in_specs=[pl.BlockSpec((tm, H), lambda i: (i, 0)),
                  pl.BlockSpec((1, H), lambda i: (0, 0)),
                  pl.BlockSpec((1, H), lambda i: (0, 0))],
        out_specs=pl.BlockSpec((tm, H), lambda i: (i, 0)),
        compiler_params=pltpu.CompilerParams(dimension_semantics=("parallel",)),
    )(x, gamma.reshape(1, H).astype(jnp.float32), beta.reshape(1, H).astype(jnp.float32))


def _attention_kernel(qkv_ref, m_ref, o_ref, *, num_heads, head_dim, scale):
    """All heads for one batch element.

    qkv_ref: (S, 3H) bf16, m_ref: (1, 1, S) f32 additive mask, o_ref: (S, H) bf16.
    Two heads per step -> 128-lane-aligned slices and lane-dense 128-wide stores.
    bf16 MXU operands, f32 accumulation / softmax.
    """
    H = num_heads * head_dim
    m = m_ref[0]                                   # (1, S) additive mask
    for h in range(0, num_heads, 2):               # static unrolled, pairs of heads
        lo, hi = h * head_dim, (h + 2) * head_dim
        qp = qkv_ref[:, lo:hi] * scale             # bf16; scale = 1/8 (exact in bf16)
        kp = qkv_ref[:, H + lo:H + hi]
        vp = qkv_ref[:, 2 * H + lo:2 * H + hi]
        outs = []
        for j in range(2):
            sl = slice(j * head_dim, (j + 1) * head_dim)
            # q @ k^T via dot_general contracting last axes (no explicit transpose).
            s = jax.lax.dot_general(
                qp[:, sl], kp[:, sl], (((1,), (1,)), ((), ())),
                preferred_element_type=jnp.float32) + m
            s = s - jnp.max(s, axis=-1, keepdims=True)
            p = jnp.exp(s)
            p = p * pl.reciprocal(jnp.sum(p, axis=-1, keepdims=True), approx=True)
            outs.append(jnp.dot(p.astype(jnp.bfloat16), vp[:, sl],
                                preferred_element_type=jnp.float32))
        o_ref[:, lo:hi] = jnp.concatenate(outs, axis=-1).astype(o_ref.dtype)


def pallas_attention(qkv, mask_add, B, S):
    """qkv: [B*S, 3*HIDDEN] bf16 (fused projections); mask_add: [B, 1, S] f32."""
    scale = 1.0 / float(np.sqrt(HEAD_DIM))
    return pl.pallas_call(
        functools.partial(_attention_kernel, num_heads=NUM_HEADS,
                          head_dim=HEAD_DIM, scale=scale),
        out_shape=jax.ShapeDtypeStruct((B * S, HIDDEN), jnp.bfloat16),
        grid=(B,),
        in_specs=[pl.BlockSpec((S, 3 * HIDDEN), lambda b: (b, 0)),
                  pl.BlockSpec((1, 1, S), lambda b: (b, 0, 0))],
        out_specs=pl.BlockSpec((S, HIDDEN), lambda b: (b, 0)),
        compiler_params=pltpu.CompilerParams(dimension_semantics=("parallel",)),
    )(qkv, mask_add)


def _head_kernel(h_ref, w_ref, b_ref, o_ref):
    # torch.mean(last_hidden_state, dim=-2) followed by Linear(768, 1),
    # done as VPU multiply + lane reduction (avoids a 1-lane-wide MXU pass).
    # TODO(synk): mean includes padding positions, matching the unmasked torch.mean.
    pooled = jnp.mean(h_ref[0].astype(jnp.float32), axis=0, keepdims=True)   # (1, H)
    y = jnp.sum(pooled * w_ref[...], axis=-1, keepdims=True)                 # (1, 1)
    o_ref[0] = y + b_ref[...]


def pallas_mean_pool_head(hidden_bsh, w, b):
    """Tiled over B so only one (S, H) slab is VMEM-resident per grid step."""
    B, S, H = hidden_bsh.shape
    out = pl.pallas_call(
        _head_kernel,
        out_shape=jax.ShapeDtypeStruct((B, 1, 1), jnp.float32),
        grid=(B,),
        in_specs=[pl.BlockSpec((1, S, H), lambda i: (i, 0, 0)),
                  pl.BlockSpec((1, H), lambda i: (0, 0)),
                  pl.BlockSpec((1, 1), lambda i: (0, 0))],
        out_specs=pl.BlockSpec((1, 1, 1), lambda i: (i, 0, 0)),
        compiler_params=pltpu.CompilerParams(dimension_semantics=("parallel",)),
    )(hidden_bsh, w.reshape(1, H).astype(jnp.float32), b.reshape(1, 1).astype(jnp.float32))
    return out.reshape(B, 1)


# ----------------------------- parameters ------------------------------------

def init_params(key):
    def dense(k, fan_in, fan_out):
        w = (jax.random.normal(k, (fan_in, fan_out), jnp.float32) * 0.02).astype(jnp.bfloat16)
        b = jnp.zeros((fan_out,), jnp.float32)
        return w, b

    keys = jax.random.split(key, 4 + NUM_LAYERS)
    params = {
        "word_emb": jax.random.normal(keys[0], (VOCAB, HIDDEN), jnp.float32) * 0.02,
        "pos_emb": jax.random.normal(keys[1], (MAX_POS, HIDDEN), jnp.float32) * 0.02,
        "type_emb": jax.random.normal(keys[2], (TYPE_VOCAB, HIDDEN), jnp.float32) * 0.02,
        "emb_ln": (jnp.ones((HIDDEN,), jnp.float32), jnp.zeros((HIDDEN,), jnp.float32)),
    }
    layers = []
    for li in range(NUM_LAYERS):
        lk = jax.random.split(keys[4 + li], 4)
        wqkv, bqkv = dense(lk[0], HIDDEN, 3 * HIDDEN)   # fused Q|K|V projection
        wo, bo = dense(lk[1], HIDDEN, HIDDEN)
        w1, b1 = dense(lk[2], HIDDEN, INTERMEDIATE)
        w2, b2 = dense(lk[3], INTERMEDIATE, HIDDEN)
        layers.append(dict(
            wqkv=wqkv, bqkv=bqkv, wo=wo, bo=bo, w1=w1, b1=b1, w2=w2, b2=b2,
            ln1_g=jnp.ones((HIDDEN,), jnp.float32), ln1_b=jnp.zeros((HIDDEN,), jnp.float32),
            ln2_g=jnp.ones((HIDDEN,), jnp.float32), ln2_b=jnp.zeros((HIDDEN,), jnp.float32)))
    params["layers"] = layers
    params["head_w"] = jax.random.normal(keys[3], (HIDDEN, 1), jnp.float32) * 0.02
    params["head_b"] = jnp.zeros((1,), jnp.float32)
    return params


# ------------------------------- forward --------------------------------------

def bert_regression_forward(params, input_ids, attention_mask, token_type_ids):
    B, S = input_ids.shape
    # embeddings (gather glue in plain JAX), then LayerNorm in Pallas (no residual)
    emb = (jnp.take(params["word_emb"], input_ids, axis=0)
           + params["pos_emb"][None, :S, :]
           + jnp.take(params["type_emb"], token_type_ids, axis=0))
    g, b = params["emb_ln"]
    h = pallas_layernorm(emb.reshape(B * S, HIDDEN).astype(jnp.float32), g, b)  # bf16

    mask_add = ((1.0 - attention_mask.astype(jnp.float32)) * -1e9).reshape(B, 1, S)

    for layer in params["layers"]:
        qkv = pallas_linear(h, layer["wqkv"], layer["bqkv"])           # [B*S, 3H] bf16
        ctx = pallas_attention(qkv, mask_add, B, S)                    # [B*S, H] bf16
        # wo linear with fused (out + h) -> LayerNorm epilogue
        h = pallas_linear(ctx, layer["wo"], layer["bo"],
                          residual=h, ln_g=layer["ln1_g"], ln_b=layer["ln1_b"])
        inter = pallas_linear(h, layer["w1"], layer["b1"], activation="gelu")
        # w2 linear (multi-K f32 accumulator) with fused (out + h) -> LayerNorm epilogue
        h = pallas_linear(inter, layer["w2"], layer["b2"],
                          residual=h, ln_g=layer["ln2_g"], ln_b=layer["ln2_b"])

    last_hidden_state = h.reshape(B, S, HIDDEN)
    return pallas_mean_pool_head(last_hidden_state, params["head_w"], params["head_b"])


# --------------------------- pure-JAX reference --------------------------------

def reference_forward(params, input_ids, attention_mask, token_type_ids):
    """Mirrors the kernels' mixed precision: bf16 operands / inter-op activations,
    f32 accumulation and f32 LayerNorm / softmax / GELU math."""
    B, S = input_ids.shape

    def ln(x, g, b):
        mu = jnp.mean(x, axis=-1, keepdims=True)
        var = jnp.mean(jnp.square(x - mu), axis=-1, keepdims=True)
        return (x - mu) * jax.lax.rsqrt(var + LN_EPS) * g + b

    def mm(a, w):
        return jnp.dot(a.astype(jnp.bfloat16), w.astype(jnp.bfloat16),
                       preferred_element_type=jnp.float32)

    emb = (jnp.take(params["word_emb"], input_ids, axis=0)
           + params["pos_emb"][None, :S, :]
           + jnp.take(params["type_emb"], token_type_ids, axis=0))
    h = ln(emb, *params["emb_ln"]).astype(jnp.bfloat16)
    mask_add = ((1.0 - attention_mask.astype(jnp.float32)) * -1e9)[:, None, None, :]

    for layer in params["layers"]:
        qkv = (mm(h, layer["wqkv"]) + layer["bqkv"]).astype(jnp.bfloat16)
        q, k, v = jnp.split(qkv, 3, axis=-1)

        def heads(t):
            return t.reshape(B, S, NUM_HEADS, HEAD_DIM).transpose(0, 2, 1, 3)

        q, k, v = heads(q) * (1.0 / np.sqrt(HEAD_DIM)), heads(k), heads(v)
        s = jnp.einsum("bhqd,bhkd->bhqk", q, k,
                       preferred_element_type=jnp.float32) + mask_add
        p = jax.nn.softmax(s, axis=-1)
        ctx = jnp.einsum("bhqk,bhkd->bhqd", p.astype(jnp.bfloat16), v,
                         preferred_element_type=jnp.float32)
        ctx = ctx.transpose(0, 2, 1, 3).reshape(B, S, HIDDEN).astype(jnp.bfloat16)

        h = ln(mm(ctx, layer["wo"]) + layer["bo"] + h.astype(jnp.float32),
               layer["ln1_g"], layer["ln1_b"]).astype(jnp.bfloat16)
        inter = jax.nn.gelu(mm(h, layer["w1"]) + layer["b1"],
                            approximate=True).astype(jnp.bfloat16)
        h = ln(mm(inter, layer["w2"]) + layer["b2"] + h.astype(jnp.float32),
               layer["ln2_g"], layer["ln2_b"]).astype(jnp.bfloat16)

    pooled = jnp.mean(h.astype(jnp.float32), axis=-2)                      # (B, H)
    return (jnp.sum(pooled * params["head_w"].reshape(1, -1), axis=-1, keepdims=True)
            + params["head_b"])


# --------------------------------- main ----------------------------------------

if __name__ == "__main__":
    key = jax.random.PRNGKey(0)
    pkey, ikey = jax.random.split(key)
    params = init_params(pkey)

    B, S = 2, 8
    input_ids = jax.random.randint(ikey, (B, S), 0, VOCAB, dtype=jnp.int32)
    attention_mask = jnp.ones((B, S), jnp.int32).at[1, -2:].set(0)
    token_type_ids = jnp.zeros((B, S), jnp.int32)

    out = bert_regression_forward(params, input_ids, attention_mask, token_type_ids)
    out = jax.block_until_ready(out)
    assert out.shape == (B, 1), out.shape

    ref = jax.block_until_ready(
        reference_forward(params, input_ids, attention_mask, token_type_ids))
    np.testing.assert_allclose(np.asarray(out), np.asarray(ref), rtol=2e-2, atol=2e-2)

    print("KERNEL_OK")
</pallas_src>

<mosaic_0001>
module attributes {stable_mosaic.version = 11 : i64} {
  func.func @_ln_kernel(%arg0: i32, %arg1: memref<16x768xf32, #tpu.memory_space<vmem>>, %arg2: memref<1x768xf32, #tpu.memory_space<vmem>>, %arg3: memref<1x768xf32, #tpu.memory_space<vmem>>, %arg4: memref<16x768xbf16, #tpu.memory_space<vmem>>) attributes {dimension_semantics = [#tpu.dimension_semantics<parallel>], iteration_bounds = array<i64: 1>, scalar_prefetch = 0 : i64, scratch_operands = 0 : i64, tpu.core_type = #tpu.core_type<tc>, window_params = [{transform_indices = @transform_0, window_bounds = array<i64: 16, 768>}, {pipeline_mode = #tpu.pipeline_mode<synchronous>, transform_indices = @transform_1, window_bounds = array<i64: 1, 768>}, {pipeline_mode = #tpu.pipeline_mode<synchronous>, transform_indices = @transform_2, window_bounds = array<i64: 1, 768>}, {transform_indices = @transform_3, window_bounds = array<i64: 16, 768>}]} {
    %c0 = arith.constant 0 : index
    %c0_0 = arith.constant 0 : index
    %0 = vector.load %arg1[%c0, %c0_0] : memref<16x768xf32, #tpu.memory_space<vmem>>, vector<16x768xf32>
    %cst = arith.constant dense<0.000000e+00> : vector<16xf32>
    %1 = vector.multi_reduction <add>, %0, %cst [1] : vector<16x768xf32> to vector<16xf32>
    %2 = vector.shape_cast %1 : vector<16xf32> to vector<16x1xf32>
    %cst_1 = arith.constant 7.680000e+02 : f32
    %3 = vector.broadcast %cst_1 : f32 to vector<16x1xf32>
    %4 = arith.divf %2, %3 : vector<16x1xf32>
    %5 = vector.broadcast %4 : vector<16x1xf32> to vector<16x768xf32>
    %6 = arith.subf %0, %5 : vector<16x768xf32>
    %7 = arith.mulf %6, %6 : vector<16x768xf32>
    %cst_2 = arith.constant dense<0.000000e+00> : vector<16xf32>
    %8 = vector.multi_reduction <add>, %7, %cst_2 [1] : vector<16x768xf32> to vector<16xf32>
    %9 = vector.shape_cast %8 : vector<16xf32> to vector<16x1xf32>
    %cst_3 = arith.constant 7.680000e+02 : f32
    %10 = vector.broadcast %cst_3 : f32 to vector<16x1xf32>
    %11 = arith.divf %9, %10 : vector<16x1xf32>
    %12 = vector.broadcast %4 : vector<16x1xf32> to vector<16x768xf32>
    %13 = arith.subf %0, %12 : vector<16x768xf32>
    %cst_4 = arith.constant 9.99999996E-13 : f32
    %14 = vector.broadcast %cst_4 : f32 to vector<16x1xf32>
    %15 = arith.addf %11, %14 : vector<16x1xf32>
    %16 = math.rsqrt %15 : vector<16x1xf32>
    %17 = vector.broadcast %16 : vector<16x1xf32> to vector<16x768xf32>
    %18 = arith.mulf %13, %17 : vector<16x768xf32>
    %c0_5 = arith.constant 0 : index
    %c0_6 = arith.constant 0 : index
    %19 = vector.load %arg2[%c0_5, %c0_6] : memref<1x768xf32, #tpu.memory_space<vmem>>, vector<1x768xf32>
    %20 = vector.broadcast %19 : vector<1x768xf32> to vector<16x768xf32>
    %21 = arith.mulf %18, %20 : vector<16x768xf32>
    %c0_7 = arith.constant 0 : index
    %c0_8 = arith.constant 0 : index
    %22 = vector.load %arg3[%c0_7, %c0_8] : memref<1x768xf32, #tpu.memory_space<vmem>>, vector<1x768xf32>
    %23 = vector.broadcast %22 : vector<1x768xf32> to vector<16x768xf32>
    %24 = arith.addf %21, %23 : vector<16x768xf32>
    %25 = arith.truncf %24 : vector<16x768xf32> to vector<16x768xbf16>
    %c0_9 = arith.constant 0 : index
    %c0_10 = arith.constant 0 : index
    %26 = vector.load %arg4[%c0_9, %c0_10] : memref<16x768xbf16, #tpu.memory_space<vmem>>, vector<16x768xbf16>
    tpu.vector_store %arg4[%c0_9, %c0_10], %25 {strides = array<i32>} : memref<16x768xbf16, #tpu.memory_space<vmem>>, vector<16x768xbf16>,
    return
  }
  func.func @transform_0(%arg0: i32) -> (i32, i32) {
    %c0_i32 = arith.constant 0 : i32
    %c0_i32_0 = arith.constant 0 : i32
    return %arg0, %c0_i32 : i32, i32
  }
  func.func @transform_1(%arg0: i32) -> (i32, i32) {
    %c0_i32 = arith.constant 0 : i32
    %c0_i32_0 = arith.constant 0 : i32
    %c0_i32_1 = arith.constant 0 : i32
    return %c0_i32, %c0_i32_0 : i32, i32
  }
  func.func @transform_2(%arg0: i32) -> (i32, i32) {
    %c0_i32 = arith.constant 0 : i32
    %c0_i32_0 = arith.constant 0 : i32
    %c0_i32_1 = arith.constant 0 : i32
    return %c0_i32, %c0_i32_0 : i32, i32
  }
  func.func @transform_3(%arg0: i32) -> (i32, i32) {
    %c0_i32 = arith.constant 0 : i32
    %c0_i32_0 = arith.constant 0 : i32
    return %arg0, %c0_i32 : i32, i32
  }
}

</mosaic_0001>

<bundles_post_ra>
// kernel: tpu_custom_call.1
= control target key start
LH: loop header
LB: loop body
LE: loop exit
PB: predicated region body
PF: predicated region fallthrough
CT: control target
= control target key end

     0   :  { %8 = vsyncpa [#allocation3], 0  ;;  %s480_s0 = inlined_call_operand.hbm [shape: f32[16,768], index: 0, kind: input, shape index: {}]   ;;  %s481_s1 = inlined_call_operand.hbm [shape: f32[1,768], index: 1, kind: input, shape index: {}]   ;;  %s482_s2 = inlined_call_operand.vmem [shape: f32[1,768], index: 2, kind: input, shape index: {}]   ;;  %s483_s3 = inlined_call_operand.hbm [shape: bf16[16,768], index: 3, kind: output, shape index: {}]  }
   0x1   :  { %9 = vsyncpa [#allocation6], 0 }
   0x2   :  { %10 = vsyncpa [#allocation4], 0  ;;  %s369_s12 = smov [#allocation2]   ;;  %s297_s16 = scalar_lea.hbm %s480_s0, 1536 }
   0x3   :  { %s16_s13 = sshll.u32 %s369_s12, 4  ;;  %p298_p0 = scmp.ne.s32.totalorder %s480_s0, %s297_s16  ;;  %s17_s13 = int_to_ptr.vmem [resolvable:$true] %s16_s13 }
   0x4   :  { %p301_p1 = scmp.lt.u32.totalorder %s297_s16, %s480_s0 }
   0x6   :  { %p303_p2 = pnand %p301_p1, %p298_p0 }
   0x8   :  { %306 = shalt.err (!%p303_p2)
}
   0x9   :  { %s307_s21 = scalar_lea.vmem %s17_s13, 1536  ;;  %p312_p4 = scmp.lt.s32.totalorder %s17_s13, %s17_s13 }
   0xa   :  { %p308_p3 = scmp.ne.s32.totalorder %s17_s13, %s307_s21  ;;  %p313_p5 = scmp.lt.s32.totalorder %s307_s21, %s307_s21 }
   0xc   :  { %p314_p6 = por %p313_p5, %p312_p4 }
   0xe   :  { %p315_p7 = pnand %p314_p6, %p308_p3 }
  0x10   :  { %318 = shalt.err (!%p315_p7)
}
  0x11   :  { %s370_s22 = smov 768   ;;  %s371_s23 = smov 48  }
  0x12   :  { %22 = dma.hbm_to_vmem [thread:$0]  %s480_s0, 1536, %s17_s13, [#allocation3], %s370_s22, %s370_s22, %s371_s23  }
  0x13   :  { %s372_s26 = smov [#allocation5]   ;;  %s319_s30 = scalar_lea.hbm %s481_s1, 96 }
  0x14   :  { %s29_s27 = sshll.u32 %s372_s26, 4  ;;  %p320_p8 = scmp.ne.s32.totalorder %s481_s1, %s319_s30  ;;  %s30_s27 = int_to_ptr.vmem [resolvable:$true] %s29_s27 }
  0x15   :  { %p323_p9 = scmp.lt.u32.totalorder %s319_s30, %s481_s1 }
  0x17   :  { %p325_p10 = pnand %p323_p9, %p320_p8 }
  0x19   :  { %328 = shalt.err (!%p325_p10)
}
  0x1a   :  { %s329_s8 = scalar_lea.vmem %s30_s27, 96  ;;  %p334_p12 = scmp.lt.s32.totalorder %s30_s27, %s30_s27 }
  0x1b   :  { %p330_p11 = scmp.ne.s32.totalorder %s30_s27, %s329_s8  ;;  %p335_p13 = scmp.lt.s32.totalorder %s329_s8, %s329_s8 }
  0x1d   :  { %p336_p0 = por %p335_p13, %p334_p12 }
  0x1f   :  { %p337_p1 = pnand %p336_p0, %p330_p11 }
  0x21   :  { %340 = shalt.err (!%p337_p1)
}
  0x22   :  { %32 = dma.hbm_to_vmem [thread:$0]  %s481_s1, 96, %s30_s27, [#allocation6]  }
  0x23   :  { %363 = dma.done.wait [#allocation3], 1536  }
  0x24   :  { %364 = vsyncadd [#allocation3], 4294965760 }
  0x25   :  { %365 = dma.done.wait [#allocation6], 96  }
  0x26   :  { %366 = vsyncadd [#allocation6], 4294967200  ;;  %v41_v0 = vld [vmem:[#allocation2] sm:$0xff]  ;;  %v42_v1 = vld [vmem:[#allocation2 + $0x8] sm:$0xff]  ;;  %v128_v62 = vlaneseq }
  0x27   :  { %v43_v2 = vld [vmem:[#allocation2 + $0x10] sm:$0xff]  ;;  %v44_v3 = vld [vmem:[#allocation2 + $0x18] sm:$0xff]  ;;  %v53_v4 = vadd.f32 %v42_v1, %v41_v0  ;;  %v49_v7 = vld [vmem:[#allocation2 + $0x40] sm:$0xff] }
  0x28   :  { %v47_v5 = vld [vmem:[#allocation2 + $0x30] sm:$0xff]  ;;  %v48_v6 = vld [vmem:[#allocation2 + $0x38] sm:$0xff]  ;;  %v45_v10 = vld [vmem:[#allocation2 + $0x20] sm:$0xff] }
  0x29   :  { %v54_v8 = vadd.f32 %v53_v4, %v43_v2  ;;  %v60_v9 = vadd.f32 %v48_v6, %v47_v5  ;;  %v50_v11 = vld [vmem:[#allocation2 + $0x48] sm:$0xff]  ;;  %v51_v15 = vld [vmem:[#allocation2 + $0x50] sm:$0xff]  ;;  %v52_v18 = vld [vmem:[#allocation2 + $0x58] sm:$0xff] }
  0x2a   :  { %v46_v14 = vld [vmem:[#allocation2 + $0x28] sm:$0xff] }
  0x2b   :  { %v55_v12 = vadd.f32 %v54_v8, %v44_v3  ;;  %v61_v13 = vadd.f32 %v60_v9, %v49_v7  ;;  %v126_v8 = vld [vmem:[#allocation5] sm:$0x3f] }
  0x2d   :  { %v56_v16 = vadd.f32 %v55_v12, %v45_v10  ;;  %v62_v17 = vadd.f32 %v61_v13, %v50_v11 }
  0x2f   :  { %v57_v19 = vadd.f32 %v56_v16, %v46_v14  ;;  %v63_v20 = vadd.f32 %v62_v17, %v51_v15 }
  0x31   :  { %58 = vadd.xlane.f32.xlu0 %v57_v19  ;;  %v64_v21 = vadd.f32 %v63_v20, %v52_v18 }
  0x35   :  { %65 = vadd.xlane.f32.xlu0 %v64_v21 }
  0xbe   :  { %v59_v22 = vpop.xlane.xlu0 %58 }
  0xbf   :  { %v68_v23 = vmul.f32 0.0013020834, %v59_v22 }
  0xc1   :  { %v420_v24 = vsub.f32 %v41_v0, %v68_v23  ;;  %v422_v25 = vsub.f32 %v42_v1, %v68_v23  ;;  %v424_v26 = vsub.f32 %v43_v2, %v68_v23  ;;  %v426_v28 = vsub.f32 %v44_v3, %v68_v23 }
  0xc2   :  { %v66_v27 = vpop.xlane.xlu0 %65  ;;  %v74_v32 = vsub.f32 %v45_v10, %v68_v23  ;;  %v75_v38 = vsub.f32 %v46_v14, %v68_v23  ;;  %v129_v2 = vshrl.u32 %v128_v62, 7 }
  0xc3   :  { %v69_v29 = vmul.f32 0.0013020834, %v66_v27  ;;  %v82_v30 = vmul.f32 %v420_v24, %v420_v24  ;;  %v83_v31 = vmul.f32 %v422_v25, %v422_v25  ;;  %v84_v33 = vmul.f32 %v424_v26, %v424_v26 }
  0xc4   :  { %v85_v39 = vmul.f32 %v426_v28, %v426_v28  ;;  %v86_v44 = vmul.f32 %v74_v32, %v74_v32  ;;  %v87_v49 = vmul.f32 %v75_v38, %v75_v38  ;;  %v130_v4 = vsub.s32 0, %v129_v2 }
  0xc5   :  { %v94_v34 = vadd.f32 %v83_v31, %v82_v30  ;;  %v434_v35 = vsub.f32 %v47_v5, %v69_v29  ;;  %v436_v36 = vsub.f32 %v48_v6, %v69_v29  ;;  %v438_v37 = vsub.f32 %v49_v7, %v69_v29 }
  0xc6   :  { %v442_v41 = vsub.f32 %v50_v11, %v69_v29  ;;  %v448_v46 = vsub.f32 %v51_v15, %v69_v29  ;;  %v81_v51 = vsub.f32 %v52_v18, %v69_v29  ;;  %v134_v5 = vsub.s32 1, %v129_v2  ;;  %v170_v11 = vld [vmem:[%s482_s2] sm:$0x3f]  ;;  %s373_s2 = smov [#allocation7]  }
  0xc7   :  { %v95_v40 = vadd.f32 %v94_v34, %v84_v33  ;;  %v88_v42 = vmul.f32 %v434_v35, %v434_v35  ;;  %v89_v43 = vmul.f32 %v436_v36, %v436_v36  ;;  %v90_v47 = vmul.f32 %v438_v37, %v438_v37  ;;  %s261_s11 = sshll.u32 %s373_s2, 4  ;;  %s262_s11 = int_to_ptr.vmem [resolvable:$true] %s261_s11 }
  0xc8   :  { %v91_v52 = vmul.f32 %v442_v41, %v442_v41  ;;  %v92_v55 = vmul.f32 %v448_v46, %v448_v46  ;;  %v93_v57 = vmul.f32 %v81_v51, %v81_v51  ;;  %v138_v6 = vsub.s32 2, %v129_v2  ;;  %s341_s12 = scalar_lea.vmem %s262_s11, 768  ;;  %p346_p3 = scmp.lt.s32.totalorder %s262_s11, %s262_s11 }
  0xc9   :  { %v96_v45 = vadd.f32 %v95_v40, %v85_v39  ;;  %v101_v48 = vadd.f32 %v89_v43, %v88_v42  ;;  %v142_v7 = vsub.s32 3, %v129_v2  ;;  %v146_v9 = vsub.s32 4, %v129_v2  ;;  %p342_p2 = scmp.ne.s32.totalorder %s262_s11, %s341_s12  ;;  %p347_p4 = scmp.lt.s32.totalorder %s341_s12, %s341_s12 }
  0xca   :  { %v150_v10 = vsub.s32 5, %v129_v2  ;;  %v131_v12 = vrot.slane %v126_v8, %v130_v4  ;;  %v135_v13 = vrot.slane %v126_v8, %v134_v5  ;;  %v139_v14 = vrot.slane %v126_v8, %v138_v6 }
  0xcb   :  { %v97_v50 = vadd.f32 %v96_v45, %v86_v44  ;;  %v102_v53 = vadd.f32 %v101_v48, %v90_v47  ;;  %v143_v15 = vrot.slane %v126_v8, %v142_v7  ;;  %v147_v17 = vrot.slane %v126_v8, %v146_v9  ;;  %p348_p5 = por %p347_p4, %p346_p3 }
  0xcc   :  { %v151_v18 = vrot.slane %v126_v8, %v150_v10  ;;  %v175_v19 = vrot.slane %v170_v11, %v130_v4  ;;  %v179_v20 = vrot.slane %v170_v11, %v134_v5  ;;  %v183_v31 = vrot.slane %v170_v11, %v138_v6 }
  0xcd   :  { %v98_v54 = vadd.f32 %v97_v50, %v87_v49  ;;  %v103_v56 = vadd.f32 %v102_v53, %v91_v52  ;;  %v187_v33 = vrot.slane %v170_v11, %v142_v7  ;;  %v191_v40 = vrot.slane %v170_v11, %v146_v9  ;;  %p349_p6 = pnand %p348_p5, %p342_p2 }
  0xce   :  { %v195_v42 = vrot.slane %v170_v11, %v150_v10 }
  0xcf   :  { %99 = vadd.xlane.f32.xlu1 %v98_v54  ;;  %v104_v58 = vadd.f32 %v103_v56, %v92_v55 }
  0xd1   :  { %v105_v59 = vadd.f32 %v104_v58, %v93_v57 }
  0xd3   :  { %106 = vadd.xlane.f32.xlu1 %v105_v59 }
 0x15c   :  { %v100_v60 = vpop.xlane.xlu1 %99 }
 0x15d   :  { %v108_v61 = vmul.f32 0.0013020834, %v100_v60 }
 0x15f   :  { %v110_v63 = vadd.f32 1e-12, %v108_v61 }
 0x160   :  { %v107_v0 = vpop.xlane.xlu1 %106 }
 0x161   :  { %293 = vrsqrt.f32 %v110_v63  ;;  %v109_v1 = vmul.f32 0.0013020834, %v107_v0 }
 0x163   :  { %v111_v3 = vadd.f32 1e-12, %v109_v1 }
 0x165   :  { %295 = vrsqrt.f32 %v111_v3 }
 0x16b   :  { %v294_v16 = vpop.eup %293 }
 0x16c   :  { %v114_v21 = vmul.f32 %v294_v16, %v420_v24  ;;  %v115_v22 = vmul.f32 %v294_v16, %v422_v25  ;;  %v116_v23 = vmul.f32 %v294_v16, %v424_v26  ;;  %v117_v27 = vmul.f32 %v294_v16, %v426_v28 }
 0x16d   :  { %v118_v29 = vmul.f32 %v294_v16, %v74_v32  ;;  %v119_v30 = vmul.f32 %v294_v16, %v75_v38 }
 0x16e   :  { %v158_v34 = vmul.f32 %v131_v12, %v114_v21  ;;  %v159_v39 = vmul.f32 %v135_v13, %v115_v22  ;;  %v160_v44 = vmul.f32 %v139_v14, %v116_v23  ;;  %v161_v45 = vmul.f32 %v143_v15, %v117_v27 }
 0x16f   :  { %v296_v43 = vpop.eup %295  ;;  %v162_v47 = vmul.f32 %v147_v17, %v118_v29  ;;  %v163_v48 = vmul.f32 %v151_v18, %v119_v30 }
 0x170   :  { %v120_v24 = vmul.f32 %v296_v43, %v434_v35  ;;  %v121_v25 = vmul.f32 %v296_v43, %v436_v36  ;;  %v122_v26 = vmul.f32 %v296_v43, %v438_v37  ;;  %v123_v28 = vmul.f32 %v296_v43, %v442_v41 }
 0x171   :  { %v124_v32 = vmul.f32 %v296_v43, %v448_v46  ;;  %v125_v38 = vmul.f32 %v296_v43, %v81_v51  ;;  %v202_v49 = vadd.f32 %v175_v19, %v158_v34  ;;  %v203_v50 = vadd.f32 %v179_v20, %v159_v39 }
 0x172   :  { %v164_v52 = vmul.f32 %v131_v12, %v120_v24  ;;  %v165_v53 = vmul.f32 %v135_v13, %v121_v25  ;;  %v166_v54 = vmul.f32 %v139_v14, %v122_v26  ;;  %v167_v55 = vmul.f32 %v143_v15, %v123_v28 }
 0x173   :  { %v168_v56 = vmul.f32 %v147_v17, %v124_v32  ;;  %v169_v57 = vmul.f32 %v151_v18, %v125_v38  ;;  %v204_v58 = vadd.f32 %v183_v31, %v160_v44  ;;  %v205_v59 = vadd.f32 %v187_v33, %v161_v45 }
 0x174   :  { %v206_v35 = vadd.f32 %v191_v40, %v162_v47  ;;  %v207_v60 = vadd.f32 %v195_v42, %v163_v48  ;;  %v208_v36 = vadd.f32 %v175_v19, %v164_v52  ;;  %v209_v61 = vadd.f32 %v179_v20, %v165_v53 }
 0x175   :  { %v210_v37 = vadd.f32 %v183_v31, %v166_v54  ;;  %v211_v41 = vadd.f32 %v187_v33, %v167_v55  ;;  %v212_v46 = vadd.f32 %v191_v40, %v168_v56  ;;  %v213_v51 = vadd.f32 %v195_v42, %v169_v57 }
 0x176   :  { %v280_v62 = vpack.c.bf16 %v203_v50, %v202_v49  ;;  %v281_v63 = vpack.c.bf16 %v205_v59, %v204_v58  ;;  %v282_v0 = vpack.c.bf16 %v207_v60, %v206_v35  ;;  %v283_v1 = vpack.c.bf16 %v209_v61, %v208_v36 }
 0x177   :  { %v284_v2 = vpack.c.bf16 %v211_v41, %v210_v37  ;;  %v285_v3 = vpack.c.bf16 %v213_v51, %v212_v46 }
 0x178   :  { %250 = vst [vmem:[#allocation7] sm:$0xff] %v280_v62  ;;  %251 = vst [vmem:[#allocation7 + $0x8] sm:$0xff] %v281_v63 }
 0x179   :  { %252 = vst [vmem:[#allocation7 + $0x10] sm:$0xff] %v282_v0  ;;  %253 = vst [vmem:[#allocation7 + $0x18] sm:$0xff] %v283_v1 }
 0x17a   :  { %254 = vst [vmem:[#allocation7 + $0x20] sm:$0xff] %v284_v2  ;;  %255 = vst [vmem:[#allocation7 + $0x28] sm:$0xff] %v285_v3 }
 0x17b   :  { %352 = shalt.err (!%p349_p6)
}
 0x17c   :  { %s353_s15 = scalar_lea.hbm %s483_s3, 768 }
 0x17d   :  { %p354_p7 = scmp.ne.s32.totalorder %s483_s3, %s353_s15  ;;  %p357_p8 = scmp.lt.u32.totalorder %s353_s15, %s483_s3 }
 0x17f   :  { %p359_p9 = pnand %p357_p8, %p354_p7 }
 0x181   :  { %362 = shalt.err (!%p359_p9)
}
 0x182   :  { %s374_s20 = smov 384   ;;  %s375_s21 = smov 24  }
 0x183   :  { %267 = dma.vmem_to_hbm [thread:$0]  %s262_s11, 768, %s483_s3, [#allocation4], %s374_s20, %s374_s20, %s375_s21  }
 0x184   :  { %367 = dma.done.wait [#allocation4], 768  }
 0x185   :  { %368 = vsyncadd [#allocation4], 4294966528 }
 0x186   :  { %271 = vsyncpa [#allocation3], 1 }
 0x187   :  { %272 = vsyncpa [#allocation6], 1 }
 0x188   :  { %273 = vsyncpa [#allocation4], 1 }

</bundles_post_ra>
